<compile_context>
chip_gen: v7x
topology: tpu7x:2x2x1
jax: 0.10.0
libtpu: 0.0.40
codegen_flags: <defaults>
</compile_context>

<pallas_src>
import jax
import jax.numpy as jnp
from jax import lax
from jax.experimental import pallas as pl
from jax.experimental.pallas import tpu as pltpu


def _pooler_kernel(x_ref, wt_ref, b_ref, o_ref):
    # x_ref:  [B, D_in]        first-token hidden states (resident across grid)
    # wt_ref: [D_in, tile_n]   pre-transposed weight tile, native dtype
    # b_ref:  [1, tile_n]      bias tile
    # o_ref:  [B, tile_n]      output tile
    y = lax.dot_general(
        x_ref[...], wt_ref[...],
        dimension_numbers=(((1,), (0,)), ((), ())),   # canonical [B,K]x[K,N] -> no transpose
        preferred_element_type=jnp.float32,            # f32 accumulation on the MXU
    )
    y = y + b_ref[...].astype(jnp.float32)
    o_ref[...] = jnp.tanh(y).astype(o_ref.dtype)


def _pick_tile_n(d: int, itemsize: int) -> int:
    """Output-dim (lane) tile size.

    Priority: 2 even tiles (balanced v7x megacore split, near-minimal grid
    steps on single-TC v5e/v6e) -> 1 full block -> largest 128-multiple
    divisor that keeps the double-buffered weight tile within a VMEM budget.
    """
    budget = 16 * 1024 * 1024  # bytes for ONE weight tile (x2 for double buffering)
    if d % 256 == 0 and d * (d // 2) * itemsize <= budget:
        return d // 2
    if d % 128 != 0 or d * d * itemsize <= budget:
        return d  # single block (non-128-multiples fall under the full-dim exemption)
    # Large 128-multiple D: largest 128-multiple divisor under the budget.
    for mult in range(d // 128, 0, -1):
        cand = mult * 128
        if d % cand == 0 and d * cand * itemsize <= budget:
            return cand
    return 128


def bert_pooler(hidden_states: jax.Array, weight: jax.Array, bias: jax.Array) -> jax.Array:
    """hidden_states: [B, S, D]; weight: [D_out, D_in] (nn.Linear layout); bias: [D] -> [B, D]."""
    x0 = hidden_states[:, 0, :]              # [CLS] token select (plain-JAX glue, fuses into XLA graph)
    B, D = x0.shape

    # Pre-transpose once to [D_in, D_out] so the kernel contraction needs no
    # XLU transpose. For static (inference) weights this is constant-folded /
    # should be stored pre-transposed by the caller.
    w_t = jnp.swapaxes(weight, 0, 1)
    bias2d = bias.reshape(1, D)

    w_itemsize = jnp.dtype(w_t.dtype).itemsize
    out_dtype = hidden_states.dtype
    tile_n = _pick_tile_n(D, w_itemsize)
    n_tiles = D // tile_n

    # Size scoped VMEM from the actual buffers (x resident + double-buffered
    # weight/bias/out tiles) with headroom, instead of a blanket limit.
    buf_bytes = (
        2 * B * D * jnp.dtype(x0.dtype).itemsize
        + 2 * D * tile_n * w_itemsize
        + 2 * tile_n * jnp.dtype(bias.dtype).itemsize
        + 2 * B * tile_n * jnp.dtype(out_dtype).itemsize
    )
    vmem_limit = min(64 * 1024 * 1024, int(buf_bytes * 1.5) + (1 << 20))

    cost = pl.CostEstimate(
        flops=2 * B * D * D,
        transcendentals=B * D,
        bytes_accessed=(D * D * w_itemsize
                        + B * D * jnp.dtype(x0.dtype).itemsize
                        + D * jnp.dtype(bias.dtype).itemsize
                        + B * D * jnp.dtype(out_dtype).itemsize),
    )

    return pl.pallas_call(
        _pooler_kernel,
        out_shape=jax.ShapeDtypeStruct((B, D), out_dtype),
        grid=(n_tiles,),
        in_specs=[
            pl.BlockSpec((B, D), lambda j: (0, 0)),        # x: resident across grid (constant index map)
            pl.BlockSpec((D, tile_n), lambda j: (0, j)),   # W^T: streamed / double-buffered tiles
            pl.BlockSpec((1, tile_n), lambda j: (0, j)),   # bias tile
        ],
        out_specs=pl.BlockSpec((B, tile_n), lambda j: (0, j)),
        compiler_params=pltpu.CompilerParams(
            dimension_semantics=("parallel",),             # independent output tiles (megacore on v7x)
            vmem_limit_bytes=vmem_limit,
        ),
        cost_estimate=cost,
    )(x0, w_t, bias2d)


if __name__ == "__main__":
    keys = jax.random.split(jax.random.PRNGKey(0), 9)

    # 1) Primary small-shape run (matches the module's expected layout).
    batch, seq, dim = 2, 8, 32
    hidden_states = jax.random.normal(keys[0], (batch, seq, dim), dtype=jnp.float32)
    weight = jax.random.normal(keys[1], (dim, dim), dtype=jnp.float32) * 0.02
    bias = jax.random.normal(keys[2], (dim,), dtype=jnp.float32) * 0.02

    out = jax.block_until_ready(bert_pooler(hidden_states, weight, bias))
    ref = jnp.tanh(hidden_states[:, 0, :] @ weight.T + bias)
    assert out.shape == (batch, dim)
    assert jnp.allclose(out, ref, atol=1e-5, rtol=1e-5), "mismatch vs reference (small)"

    # 2) BERT-base sized check exercising the even 2-tile grid path
    #    (D=768 -> tile_n=384, grid=(2,)).
    b2, s2, d2 = 8, 4, 768
    h2 = jax.random.normal(keys[3], (b2, s2, d2), dtype=jnp.float32)
    w2 = jax.random.normal(keys[4], (d2, d2), dtype=jnp.float32) * 0.02
    bb2 = jax.random.normal(keys[5], (d2,), dtype=jnp.float32) * 0.02
    out2 = jax.block_until_ready(bert_pooler(h2, w2, bb2))
    ref2 = jnp.tanh(h2[:, 0, :] @ w2.T + bb2)
    assert out2.shape == (b2, d2)
    assert jnp.allclose(out2, ref2, atol=2e-3, rtol=2e-3), "mismatch vs reference (tiled)"

    # 3) bf16 operands (halves the HBM weight stream; kernel consumes native
    #    dtype with f32 MXU accumulation).
    b3, s3, d3 = 4, 4, 256
    h3 = jax.random.normal(keys[6], (b3, s3, d3), dtype=jnp.bfloat16)
    w3 = (jax.random.normal(keys[7], (d3, d3), dtype=jnp.float32) * 0.02).astype(jnp.bfloat16)
    bb3 = (jax.random.normal(keys[8], (d3,), dtype=jnp.float32) * 0.02).astype(jnp.bfloat16)
    out3 = jax.block_until_ready(bert_pooler(h3, w3, bb3))
    ref3 = jnp.tanh(h3[:, 0, :].astype(jnp.float32) @ w3.T.astype(jnp.float32)
                    + bb3.astype(jnp.float32))
    assert out3.shape == (b3, d3)
    assert jnp.allclose(out3.astype(jnp.float32), ref3, atol=2e-2, rtol=2e-2), \
        "mismatch vs reference (bf16)"

    print("KERNEL_OK")
</pallas_src>

<mosaic_0001>
module attributes {stable_mosaic.version = 11 : i64} {
  func.func @_pooler_kernel(%arg0: i32, %arg1: memref<2x32xf32, #tpu.memory_space<vmem>>, %arg2: memref<32x32xf32, #tpu.memory_space<vmem>>, %arg3: memref<1x32xf32, #tpu.memory_space<vmem>>, %arg4: memref<2x32xf32, #tpu.memory_space<vmem>>) attributes {dimension_semantics = [#tpu.dimension_semantics<parallel>], iteration_bounds = array<i64: 1>, scalar_prefetch = 0 : i64, scratch_operands = 0 : i64, tpu.core_type = #tpu.core_type<tc>, window_params = [{pipeline_mode = #tpu.pipeline_mode<synchronous>, transform_indices = @transform_0, window_bounds = array<i64: 2, 32>}, {transform_indices = @transform_1, window_bounds = array<i64: 32, 32>}, {transform_indices = @transform_2, window_bounds = array<i64: 1, 32>}, {transform_indices = @transform_3, window_bounds = array<i64: 2, 32>}]} {
    %c0 = arith.constant 0 : index
    %c0_0 = arith.constant 0 : index
    %0 = vector.load %arg1[%c0, %c0_0] : memref<2x32xf32, #tpu.memory_space<vmem>>, vector<2x32xf32>
    %c0_1 = arith.constant 0 : index
    %c0_2 = arith.constant 0 : index
    %1 = vector.load %arg2[%c0_1, %c0_2] : memref<32x32xf32, #tpu.memory_space<vmem>>, vector<32x32xf32>
    %cst = arith.constant dense<0.000000e+00> : vector<2x32xf32>
    %2 = tpu.matmul %0, %1, %cst {dimension_numbers = #tpu.dot_dimension_numbers<[1], [0], [0], [1], [0, 0, 1, 1], [], []>} : vector<2x32xf32>, vector<32x32xf32>, vector<2x32xf32> -> vector<2x32xf32>
    %c0_3 = arith.constant 0 : index
    %c0_4 = arith.constant 0 : index
    %3 = vector.load %arg3[%c0_3, %c0_4] : memref<1x32xf32, #tpu.memory_space<vmem>>, vector<1x32xf32>
    %4 = vector.broadcast %3 : vector<1x32xf32> to vector<2x32xf32>
    %5 = arith.addf %2, %4 : vector<2x32xf32>
    %6 = math.tanh %5 : vector<2x32xf32>
    %c0_5 = arith.constant 0 : index
    %c0_6 = arith.constant 0 : index
    %7 = vector.load %arg4[%c0_5, %c0_6] : memref<2x32xf32, #tpu.memory_space<vmem>>, vector<2x32xf32>
    tpu.vector_store %arg4[%c0_5, %c0_6], %6 {strides = array<i32>} : memref<2x32xf32, #tpu.memory_space<vmem>>, vector<2x32xf32>,
    return
  }
  func.func @transform_0(%arg0: i32) -> (i32, i32) {
    %c0_i32 = arith.constant 0 : i32
    %c0_i32_0 = arith.constant 0 : i32
    %c0_i32_1 = arith.constant 0 : i32
    return %c0_i32, %c0_i32_0 : i32, i32
  }
  func.func @transform_1(%arg0: i32) -> (i32, i32) {
    %c0_i32 = arith.constant 0 : i32
    %c0_i32_0 = arith.constant 0 : i32
    return %c0_i32, %arg0 : i32, i32
  }
  func.func @transform_2(%arg0: i32) -> (i32, i32) {
    %c0_i32 = arith.constant 0 : i32
    %c0_i32_0 = arith.constant 0 : i32
    return %c0_i32, %arg0 : i32, i32
  }
  func.func @transform_3(%arg0: i32) -> (i32, i32) {
    %c0_i32 = arith.constant 0 : i32
    %c0_i32_0 = arith.constant 0 : i32
    return %c0_i32, %arg0 : i32, i32
  }
}

</mosaic_0001>

<bundles_post_ra>
// kernel: tpu_custom_call.1
= control target key start
LH: loop header
LB: loop body
LE: loop exit
PB: predicated region body
PF: predicated region fallthrough
CT: control target
= control target key end

     0   :  { %8 = vsyncpa [#allocation3], 0  ;;  %s326_s0 = inlined_call_operand.hbm [shape: f32[2,32], index: 0, kind: input, shape index: {}]   ;;  %s327_s1 = inlined_call_operand.hbm [shape: f32[32,32], index: 1, kind: input, shape index: {}]   ;;  %s328_s2 = inlined_call_operand.vmem [shape: f32[1,32], index: 2, kind: input, shape index: {}]   ;;  %s329_s3 = inlined_call_operand.hbm [shape: f32[2,32], index: 3, kind: output, shape index: {}]  }
   0x1   :  { %9 = vsyncpa [#allocation6], 0 }
   0x2   :  { %10 = vsyncpa [#allocation4], 0  ;;  %s252_s12 = smov [#allocation2]   ;;  %s253_s14 = smov [#allocation5]  }
   0x3   :  { %s17_s13 = sshll.u32 %s252_s12, 4  ;;  %s26_s15 = sshll.u32 %s253_s14, 4  ;;  %s18_s13 = int_to_ptr.vmem [resolvable:$true] %s17_s13  ;;  %s280_s15 = int_to_ptr.vmem [resolvable:$true] %s26_s15 }
   0x4   :  { %s180_s18 = scalar_lea.hbm %s326_s0, 32 }
   0x5   :  { %p181_p0 = scmp.ne.s32.totalorder %s326_s0, %s180_s18  ;;  %p184_p1 = scmp.lt.u32.totalorder %s180_s18, %s326_s0 }
   0x7   :  { %p186_p2 = pnand %p184_p1, %p181_p0 }
   0x9   :  { %189 = shalt.err (!%p186_p2)
}
   0xa   :  { %s190_s23 = scalar_lea.vmem %s18_s13, 32  ;;  %p195_p4 = scmp.lt.s32.totalorder %s18_s13, %s18_s13 }
   0xb   :  { %p191_p3 = scmp.ne.s32.totalorder %s18_s13, %s190_s23  ;;  %p196_p5 = scmp.lt.s32.totalorder %s190_s23, %s190_s23 }
   0xd   :  { %p197_p6 = por %p196_p5, %p195_p4 }
   0xf   :  { %p198_p7 = pnand %p197_p6, %p191_p3 }
  0x11   :  { %201 = shalt.err (!%p198_p7)
}
  0x12   :  { %20 = dma.hbm_to_vmem [thread:$0]  %s326_s0, 32, %s18_s13, [#allocation3]  }
  0x13   :  { %s202_s28 = scalar_lea.hbm %s327_s1, 512 }
  0x14   :  { %p203_p8 = scmp.ne.s32.totalorder %s327_s1, %s202_s28  ;;  %p206_p9 = scmp.lt.u32.totalorder %s202_s28, %s327_s1 }
  0x16   :  { %p208_p10 = pnand %p206_p9, %p203_p8 }
  0x18   :  { %211 = shalt.err (!%p208_p10)
}
  0x19   :  { %s212_s6 = scalar_lea.vmem %s280_s15, 512  ;;  %p217_p12 = scmp.lt.s32.totalorder %s280_s15, %s280_s15 }
  0x1a   :  { %p213_p11 = scmp.ne.s32.totalorder %s280_s15, %s212_s6  ;;  %p218_p13 = scmp.lt.s32.totalorder %s212_s6, %s212_s6 }
  0x1c   :  { %p219_p0 = por %p218_p13, %p217_p12 }
  0x1e   :  { %p220_p1 = pnand %p219_p0, %p213_p11 }
  0x20   :  { %223 = shalt.err (!%p220_p1)
}
  0x21   :  { %s254_s0 = smov 128   ;;  %s255_s7 = smov 8  }
  0x22   :  { %32 = dma.hbm_to_vmem [thread:$0]  %s327_s1, 512, %s280_s15, [#allocation6], %s254_s0, %s254_s0, %s255_s7  }
  0x23   :  { %246 = dma.done.wait [#allocation3], 32  }
  0x24   :  { %247 = vsyncadd [#allocation3], 4294967264 }
  0x25   :  { %248 = dma.done.wait [#allocation6], 512  }
  0x26   :  { %249 = vsyncadd [#allocation6], 4294966784  ;;  %v256_v0 = vmov 0.0|0.0   ;;  %vm257_vm0 = vmmov 0   ;;  %v258_v1 = vmov 0.0   ;;  %v42_v2 = vld [vmem:[#allocation5] sm:$0xff] }
  0x27   :  { %164 = vmatprep.subr.bf16.mxu0 %v256_v0  ;;  %161 = vmatprep.mubr.msk.f32.mxu0 %vm257_vm0, %v258_v1  ;;  %v43_v3 = vld [vmem:[#allocation5 + $0x8] sm:$0xff]  ;;  %v44_v4 = vld [vmem:[#allocation5 + $0x10] sm:$0xff]  ;;  %v45_v6 = vld [vmem:[#allocation5 + $0x18] sm:$0xff]  ;;  %vm53_vm1 = vcmask 261120   ;;  %s259_s11 = smov [#allocation7]   ;;  %vm128_vm2 = vcmask 254976  }
  0x28   :  { %v165_v5 = vpack.c.bf16 %v43_v3, %v42_v2  ;;  %v168_v7 = vpack.c.bf16 %v45_v6, %v44_v4  ;;  %v41_v8 = vld [vmem:[#allocation2] sm:$0x3]  ;;  %s136_s12 = sshll.u32 %s259_s11, 4  ;;  %s137_s12 = int_to_ptr.vmem [resolvable:$true] %s136_s12 }
  0x29   :  { %v146_v9 = vld [vmem:[%s328_s2] ss:$0 sm:$0xff]  ;;  %s224_s13 = scalar_lea.vmem %s137_s12, 32  ;;  %p229_p3 = scmp.lt.s32.totalorder %s137_s12, %s137_s12 }
  0x2a   :  { %166 = vmatpush3.bf16.msra.mxu0 %v165_v5  ;;  %p225_p2 = scmp.ne.s32.totalorder %s137_s12, %s224_s13  ;;  %p230_p4 = scmp.lt.s32.totalorder %s224_s13, %s224_s13 }
  0x2b   :  { %167 = vmatprep.subr.bf16.mxu0 %v256_v0 }
  0x2c   :  { %p231_p5 = por %p230_p4, %p229_p3 }
  0x2e   :  { %169 = vmatpush3.bf16.msra.mxu0 %v168_v7  ;;  %p232_p6 = pnand %p231_p5, %p225_p2 }
  0x31   :  { %162 = vmatmul.mubr.msk.f32.vlgmr.msra.gmra.mrb[0].mxu0 %vm53_vm1, %v41_v8 }
 0x104   :  { %v123_v10 = vpop.f32.mrb[0].mxu0 }
 0x105   :  { %v124_v11 = vadd.f32 %v146_v9, %v123_v10  ;;  %v163_v12 = vpop.f32.mrb[1].mxu0 }
 0x107   :  { %178 = vtanh.f32 %v124_v11 }
 0x111   :  { %v179_v13 = vpop.eup %178 }
 0x112   :  { %129 = vst.msk [vmem:[#allocation7] sm:$0x3] %vm128_vm2, %v179_v13 }
 0x113   :  { %235 = shalt.err (!%p232_p6)
}
 0x114   :  { %s236_s2 = scalar_lea.hbm %s329_s3, 32 }
 0x115   :  { %p237_p7 = scmp.ne.s32.totalorder %s329_s3, %s236_s2  ;;  %p240_p8 = scmp.lt.u32.totalorder %s236_s2, %s329_s3 }
 0x117   :  { %p242_p9 = pnand %p240_p8, %p237_p7 }
 0x119   :  { %245 = shalt.err (!%p242_p9)
}
 0x11a   :  { %139 = dma.vmem_to_hbm [thread:$0]  %s137_s12, 32, %s329_s3, [#allocation4]  }
 0x11b   :  { %250 = dma.done.wait [#allocation4], 32  }
 0x11c   :  { %251 = vsyncadd [#allocation4], 4294967264 }
 0x11d   :  { %143 = vsyncpa [#allocation3], 1 }
 0x11e   :  { %144 = vsyncpa [#allocation6], 1 }
 0x11f   :  { %145 = vsyncpa [#allocation4], 1 }

</bundles_post_ra>
